<compile_context>
chip_gen: v7x
topology: tpu7x:2x2x1
jax: 0.10.0
libtpu: 0.0.40
codegen_flags: <defaults>
</compile_context>

<pallas_src>
import jax
import jax.numpy as jnp
from jax import lax
from jax.experimental import pallas as pl
from jax.experimental.pallas import tpu as pltpu


def _round_up(x, m):
    return ((x + m - 1) // m) * m


def _min_sublanes(dtype):
    # Minimum second-to-last-dim tile per dtype: f32/i32 -> 8, bf16 -> 16, i8 -> 32.
    return {4: 8, 2: 16, 1: 32}[jnp.dtype(dtype).itemsize]


# --------------------------------------------------------------------------
# Fast path: tables VMEM-resident, gather via exact one-hot matmul on the MXU.
# --------------------------------------------------------------------------
def gmf_vmem_kernel(uid_ref, iid_ref, p_ref, q_ref, out_ref):
    tile_b = out_ref.shape[0]
    n_users = p_ref.shape[0]
    n_items = q_ref.shape[0]

    uid = uid_ref[...]                                    # (tile_b, 1) int32
    iid = iid_ref[...]                                    # (tile_b, 1) int32

    u_iota = lax.broadcasted_iota(jnp.int32, (tile_b, n_users), 1)
    i_iota = lax.broadcasted_iota(jnp.int32, (tile_b, n_items), 1)

    # One-hot rows (exact 0/1 weights) contracted against the table => gather.
    p_onehot = (u_iota == uid).astype(p_ref.dtype)        # (tile_b, n_users)
    q_onehot = (i_iota == iid).astype(q_ref.dtype)        # (tile_b, n_items)

    pu = jnp.dot(p_onehot, p_ref[...], preferred_element_type=jnp.float32)
    qi = jnp.dot(q_onehot, q_ref[...], preferred_element_type=jnp.float32)

    out_ref[...] = (pu * qi).astype(out_ref.dtype)


# --------------------------------------------------------------------------
# Large-table path: HBM-resident tables, fused DMA row-gather.
# --------------------------------------------------------------------------
def gmf_dma_kernel(
    uid_ref, iid_ref,      # scalar-prefetch ids in SMEM, shape (Bp,) int32
    p_hbm, q_hbm,          # embedding tables, HBM-resident (pl.ANY)
    out_ref,               # (tile_b, k) VMEM output block
    pu_buf, qi_buf,        # (tile_b, k) VMEM gather buffers (scratch)
    sem,                   # DMA semaphores, shape (2,)  [0]=P rows, [1]=Q rows
):
    tile_b = out_ref.shape[0]
    base = pl.program_id(0) * tile_b

    # Issue tile_b row-gather DMAs per table; partially unrolled so the
    # descriptor pushes (vector-misc slot) and SMEM id loads co-issue.
    def issue(r, carry):
        u = uid_ref[base + r]
        i = iid_ref[base + r]
        pltpu.make_async_copy(
            p_hbm.at[pl.ds(u, 1), :], pu_buf.at[pl.ds(r, 1), :], sem.at[0]
        ).start()
        pltpu.make_async_copy(
            q_hbm.at[pl.ds(i, 1), :], qi_buf.at[pl.ds(r, 1), :], sem.at[1]
        ).start()
        return carry

    lax.fori_loop(0, tile_b, issue, 0, unroll=8)

    # ONE aggregate wait per table: the wait descriptor spans the whole
    # (tile_b, k) scratch buffer, so it drains exactly tile_b*k*itemsize bytes
    # = the sum of all tile_b row-copy completions signaled on that semaphore.
    pltpu.make_async_copy(pu_buf, pu_buf, sem.at[0]).wait()
    pltpu.make_async_copy(qi_buf, qi_buf, sem.at[1]).wait()

    # TODO(synk): cross-step double-buffering of the gather (scratch (2,tile_b,k)
    # + DMA((2,2))) would hide the gather latency but requires a sequential
    # ("arbitrary") grid axis; kept out to preserve the "parallel" axis for v7x.
    out_ref[...] = (
        pu_buf[...].astype(jnp.float32) * qi_buf[...].astype(jnp.float32)
    ).astype(out_ref.dtype)


# ------------------------------- wrapper -------------------------------------
def gmf_forward(params, user_ids, item_ids, *, tile_b=1024, force_dma=False,
                vmem_table_limit_bytes=4 * 1024 * 1024, max_onehot_rows=2048):
    P = params["P"]                      # (n_users, k)
    Q = params["Q"]                      # (n_items, k)
    n_users, k = P.shape
    n_items = Q.shape[0]
    B = int(user_ids.shape[0])

    dtype = P.dtype
    itemsize = jnp.dtype(dtype).itemsize
    sub = max(_min_sublanes(dtype), 8)   # ids are int32 -> at least 8 sublanes

    # Clamp ids: an out-of-range id would otherwise drive an OOB HBM DMA.
    uid = jnp.clip(jnp.asarray(user_ids, jnp.int32), 0, n_users - 1)
    iid = jnp.clip(jnp.asarray(item_ids, jnp.int32), 0, n_items - 1)

    table_bytes = (n_users + n_items) * k * itemsize
    use_fast = (not force_dma
                and table_bytes <= vmem_table_limit_bytes
                and max(n_users, n_items) <= max_onehot_rows)

    # Tile selection: dtype-aware sublane rounding; prefer >=2 grid steps so
    # v7x's two TensorCores both get work (no-op on v5e/v6e).
    tile_req = min(tile_b, 256) if use_fast else tile_b
    tile = max(sub, (min(tile_req, _round_up(B, sub)) // sub) * sub)
    Bp = _round_up(B, tile)
    if Bp == tile and B > sub:
        tile = _round_up((B + 1) // 2, sub)
        Bp = _round_up(B, tile)
    pad = Bp - B
    if pad:
        uid = jnp.pad(uid, (0, pad))     # pad with row 0 (valid, sliced away)
        iid = jnp.pad(iid, (0, pad))

    cost = pl.CostEstimate(
        flops=2 * B * k,
        transcendentals=0,
        bytes_accessed=3 * B * k * itemsize + 2 * B * 4,
    )
    cparams = pltpu.CompilerParams(
        dimension_semantics=("parallel",),        # batch tiles split over TCs
        vmem_limit_bytes=32 * 1024 * 1024,        # safe on v5e/v6e/v7x, tiny usage
    )

    if use_fast:
        # Pad table rows to the sublane multiple (padded rows never selected).
        nu_p = _round_up(n_users, sub)
        ni_p = _round_up(n_items, sub)
        Pp = jnp.pad(P, ((0, nu_p - n_users), (0, 0)))
        Qp = jnp.pad(Q, ((0, ni_p - n_items), (0, 0)))

        out = pl.pallas_call(
            gmf_vmem_kernel,
            out_shape=jax.ShapeDtypeStruct((Bp, k), dtype),
            grid_spec=pl.GridSpec(
                grid=(Bp // tile,),
                in_specs=[
                    pl.BlockSpec((tile, 1), lambda t: (t, 0)),
                    pl.BlockSpec((tile, 1), lambda t: (t, 0)),
                    pl.BlockSpec((nu_p, k), lambda t: (0, 0)),  # whole table
                    pl.BlockSpec((ni_p, k), lambda t: (0, 0)),  # whole table
                ],
                out_specs=pl.BlockSpec((tile, k), lambda t: (t, 0)),
            ),
            compiler_params=cparams,
            cost_estimate=cost,
        )(uid.reshape(Bp, 1), iid.reshape(Bp, 1), Pp, Qp)
    else:
        out = pl.pallas_call(
            gmf_dma_kernel,
            out_shape=jax.ShapeDtypeStruct((Bp, k), dtype),
            grid_spec=pltpu.PrefetchScalarGridSpec(
                num_scalar_prefetch=2,
                grid=(Bp // tile,),
                in_specs=[
                    pl.BlockSpec(memory_space=pl.ANY),   # P table stays in HBM
                    pl.BlockSpec(memory_space=pl.ANY),   # Q table stays in HBM
                ],
                out_specs=pl.BlockSpec((tile, k), lambda t, u_sr, i_sr: (t, 0)),
                scratch_shapes=[
                    pltpu.VMEM((tile, k), P.dtype),
                    pltpu.VMEM((tile, k), Q.dtype),
                    pltpu.SemaphoreType.DMA((2,)),
                ],
            ),
            compiler_params=cparams,
            cost_estimate=cost,
        )(uid, iid, P, Q)

    return out[:B]


# ------------------------- pure-JAX reference --------------------------------
def gmf_reference(params, user_ids, item_ids):
    pu = jnp.take(params["P"], user_ids, axis=0)
    qi = jnp.take(params["Q"], item_ids, axis=0)
    return pu * qi


# ------------------------------ param init -----------------------------------
def init_params(key, n_users, n_items, k):
    k0, k1, k2 = jax.random.split(key, 3)
    return {
        "P": 0.01 * jax.random.normal(k0, (n_users, k), jnp.float32),
        "Q": 0.01 * jax.random.normal(k1, (n_items, k), jnp.float32),
        # Present in the PyTorch module but unused by forward(); kept for parity.
        "h_w": 0.01 * jax.random.normal(k2, (1, k), jnp.float32),
    }


if __name__ == "__main__":
    n_users, n_items, k = 100, 150, 32
    batch = 8

    key = jax.random.PRNGKey(0)
    pkey, ukey, ikey = jax.random.split(key, 3)
    params = init_params(pkey, n_users, n_items, k)

    user_ids = jax.random.randint(ukey, (batch,), 0, n_users, dtype=jnp.int32)
    item_ids = jax.random.randint(ikey, (batch,), 0, n_items, dtype=jnp.int32)

    ref = gmf_reference(params, user_ids, item_ids)

    # Fast path (tables fit in VMEM): in-kernel one-hot gather, no manual DMAs.
    out_fast = jax.block_until_ready(gmf_forward(params, user_ids, item_ids))
    assert out_fast.shape == (batch, k), out_fast.shape
    assert jnp.allclose(out_fast, ref, atol=1e-6, rtol=1e-6), (out_fast, ref)

    # Large-table path (forced): HBM-resident tables, fused DMA row-gather with
    # unrolled issue + single aggregate wait per table.
    out_dma = jax.block_until_ready(
        gmf_forward(params, user_ids, item_ids, force_dma=True)
    )
    assert out_dma.shape == (batch, k), out_dma.shape
    assert jnp.allclose(out_dma, ref, atol=1e-6, rtol=1e-6), (out_dma, ref)

    print("KERNEL_OK")
</pallas_src>

<mosaic_0001>
module attributes {stable_mosaic.version = 11 : i64} {
  func.func @gmf_vmem_kernel(%arg0: i32, %arg1: memref<8x1xi32, #tpu.memory_space<vmem>>, %arg2: memref<8x1xi32, #tpu.memory_space<vmem>>, %arg3: memref<104x32xf32, #tpu.memory_space<vmem>>, %arg4: memref<152x32xf32, #tpu.memory_space<vmem>>, %arg5: memref<8x32xf32, #tpu.memory_space<vmem>>) attributes {dimension_semantics = [#tpu.dimension_semantics<parallel>], iteration_bounds = array<i64: 1>, scalar_prefetch = 0 : i64, scratch_operands = 0 : i64, tpu.core_type = #tpu.core_type<tc>, window_params = [{transform_indices = @transform_0, window_bounds = array<i64: 8, 1>}, {transform_indices = @transform_1, window_bounds = array<i64: 8, 1>}, {pipeline_mode = #tpu.pipeline_mode<synchronous>, transform_indices = @transform_2, window_bounds = array<i64: 104, 32>}, {pipeline_mode = #tpu.pipeline_mode<synchronous>, transform_indices = @transform_3, window_bounds = array<i64: 152, 32>}, {transform_indices = @transform_4, window_bounds = array<i64: 8, 32>}]} {
    %c0 = arith.constant 0 : index
    %c0_0 = arith.constant 0 : index
    %0 = vector.load %arg1[%c0, %c0_0] : memref<8x1xi32, #tpu.memory_space<vmem>>, vector<8x1xi32>
    %c0_1 = arith.constant 0 : index
    %c0_2 = arith.constant 0 : index
    %1 = vector.load %arg2[%c0_1, %c0_2] : memref<8x1xi32, #tpu.memory_space<vmem>>, vector<8x1xi32>
    %2 = tpu.iota {dimensions = array<i32: 1>} : vector<8x104xi32>
    %3 = tpu.iota {dimensions = array<i32: 1>} : vector<8x152xi32>
    %4 = vector.broadcast %0 : vector<8x1xi32> to vector<8x104xi32>
    %5 = arith.cmpi eq, %2, %4 : vector<8x104xi32>
    %6 = arith.extui %5 : vector<8x104xi1> to vector<8x104xi32>
    %7 = arith.sitofp %6 : vector<8x104xi32> to vector<8x104xf32>
    %8 = vector.broadcast %1 : vector<8x1xi32> to vector<8x152xi32>
    %9 = arith.cmpi eq, %3, %8 : vector<8x152xi32>
    %10 = arith.extui %9 : vector<8x152xi1> to vector<8x152xi32>
    %11 = arith.sitofp %10 : vector<8x152xi32> to vector<8x152xf32>
    %c0_3 = arith.constant 0 : index
    %c0_4 = arith.constant 0 : index
    %12 = vector.load %arg3[%c0_3, %c0_4] : memref<104x32xf32, #tpu.memory_space<vmem>>, vector<104x32xf32>
    %cst = arith.constant dense<0.000000e+00> : vector<8x32xf32>
    %13 = tpu.matmul %7, %12, %cst {dimension_numbers = #tpu.dot_dimension_numbers<[1], [0], [0], [1], [0, 0, 1, 1], [], []>} : vector<8x104xf32>, vector<104x32xf32>, vector<8x32xf32> -> vector<8x32xf32>
    %c0_5 = arith.constant 0 : index
    %c0_6 = arith.constant 0 : index
    %14 = vector.load %arg4[%c0_5, %c0_6] : memref<152x32xf32, #tpu.memory_space<vmem>>, vector<152x32xf32>
    %cst_7 = arith.constant dense<0.000000e+00> : vector<8x32xf32>
    %15 = tpu.matmul %11, %14, %cst_7 {dimension_numbers = #tpu.dot_dimension_numbers<[1], [0], [0], [1], [0, 0, 1, 1], [], []>} : vector<8x152xf32>, vector<152x32xf32>, vector<8x32xf32> -> vector<8x32xf32>
    %16 = arith.mulf %13, %15 : vector<8x32xf32>
    %c0_8 = arith.constant 0 : index
    %c0_9 = arith.constant 0 : index
    %17 = vector.load %arg5[%c0_8, %c0_9] : memref<8x32xf32, #tpu.memory_space<vmem>>, vector<8x32xf32>
    tpu.vector_store %arg5[%c0_8, %c0_9], %16 {strides = array<i32>} : memref<8x32xf32, #tpu.memory_space<vmem>>, vector<8x32xf32>,
    return
  }
  func.func @transform_0(%arg0: i32) -> (i32, i32) {
    %c0_i32 = arith.constant 0 : i32
    %c0_i32_0 = arith.constant 0 : i32
    return %arg0, %c0_i32 : i32, i32
  }
  func.func @transform_1(%arg0: i32) -> (i32, i32) {
    %c0_i32 = arith.constant 0 : i32
    %c0_i32_0 = arith.constant 0 : i32
    return %arg0, %c0_i32 : i32, i32
  }
  func.func @transform_2(%arg0: i32) -> (i32, i32) {
    %c0_i32 = arith.constant 0 : i32
    %c0_i32_0 = arith.constant 0 : i32
    %c0_i32_1 = arith.constant 0 : i32
    return %c0_i32, %c0_i32_0 : i32, i32
  }
  func.func @transform_3(%arg0: i32) -> (i32, i32) {
    %c0_i32 = arith.constant 0 : i32
    %c0_i32_0 = arith.constant 0 : i32
    %c0_i32_1 = arith.constant 0 : i32
    return %c0_i32, %c0_i32_0 : i32, i32
  }
  func.func @transform_4(%arg0: i32) -> (i32, i32) {
    %c0_i32 = arith.constant 0 : i32
    %c0_i32_0 = arith.constant 0 : i32
    return %arg0, %c0_i32 : i32, i32
  }
}

</mosaic_0001>

<bundles_post_ra>
// kernel: tpu_custom_call.1
= control target key start
LH: loop header
LB: loop body
LE: loop exit
PB: predicated region body
PF: predicated region fallthrough
CT: control target
= control target key end

     0   :  { %v360_v2 = vmov 0   ;;  %v361_v3 = vmov 0.0|0.0   ;;  %vm362_vm0 = vmmov 0   ;;  %v363_v20 = vmov 0.0   ;;  %s525_s0 = inlined_call_operand.vmem [shape: s32[8,1], index: 0, kind: input, shape index: {}]   ;;  %s526_s1 = inlined_call_operand.vmem [shape: s32[8,1], index: 1, kind: input, shape index: {}]   ;;  %s527_s2 = inlined_call_operand.vmem [shape: f32[104,32], index: 2, kind: input, shape index: {}]   ;;  %s528_s3 = inlined_call_operand.vmem [shape: f32[152,32], index: 3, kind: input, shape index: {}]   ;;  %s529_s4 = inlined_call_operand.hbm [shape: f32[8,32], index: 4, kind: output, shape index: {}]  }
   0x1   :  { %v19_v0 = vld [vmem:[%s526_s1] sm:$0xff]  ;;  %335 = vset.pattern.permute.xlu0 %v360_v2  ;;  %302 = vmatprep.subr.bf16.mxu1 %v361_v3  ;;  %v126_v4 = vld [vmem:[%s528_s3 + $0x8] sm:$0xff]  ;;  %v127_v5 = vld [vmem:[%s528_s3 + $0x10] sm:$0xff] }
   0x2   :  { %v125_v1 = vld [vmem:[%s528_s3] sm:$0xff]  ;;  %v128_v6 = vld [vmem:[%s528_s3 + $0x18] sm:$0xff]  ;;  %30 = vperm.xlu0 %335, %v19_v0   ;;  %284 = vmatprep.subr.bf16.mxu0 %v361_v3  ;;  %v39_v10 = vld [vmem:[%s527_s2 + $0x8] sm:$0xff] }
   0x3   :  { %v303_v7 = vpack.c.bf16 %v126_v4, %v125_v1  ;;  %v18_v8 = vld [vmem:[%s525_s0] sm:$0xff]  ;;  %v306_v11 = vpack.c.bf16 %v128_v6, %v127_v5  ;;  %v40_v13 = vld [vmem:[%s527_s2 + $0x10] sm:$0xff]  ;;  %v130_v15 = vld [vmem:[%s528_s3 + $0x28] sm:$0xff]  ;;  %281 = vmatprep.mubr.msk.f32.mxu0 %vm362_vm0, %v363_v20 }
   0x4   :  { %v38_v9 = vld [vmem:[%s527_s2] sm:$0xff]  ;;  %v41_v16 = vld [vmem:[%s527_s2 + $0x18] sm:$0xff]  ;;  %v43_v19 = vld [vmem:[%s527_s2 + $0x28] sm:$0xff] }
   0x5   :  { %304 = vmatpush1.bf16.msra.mxu1 %v303_v7  ;;  %v285_v12 = vpack.c.bf16 %v39_v10, %v38_v9  ;;  %v129_v14 = vld [vmem:[%s528_s3 + $0x20] sm:$0xff]  ;;  %v288_v17 = vpack.c.bf16 %v41_v16, %v40_v13  ;;  %v131_v22 = vld [vmem:[%s528_s3 + $0x30] sm:$0xff]  ;;  %v132_v23 = vld [vmem:[%s528_s3 + $0x38] sm:$0xff] }
   0x6   :  { %305 = vmatprep.subr.bf16.mxu1 %v361_v3  ;;  %24 = vperm.xlu0 %335, %v18_v8   ;;  %v42_v18 = vld [vmem:[%s527_s2 + $0x20] sm:$0xff]  ;;  %v309_v21 = vpack.c.bf16 %v130_v15, %v129_v14  ;;  %v44_v25 = vld [vmem:[%s527_s2 + $0x30] sm:$0xff]  ;;  %v45_v26 = vld [vmem:[%s527_s2 + $0x38] sm:$0xff] }
   0x7   :  { %286 = vmatpush3.bf16.msra.mxu0 %v285_v12  ;;  %v291_v24 = vpack.c.bf16 %v43_v19, %v42_v18 }
   0x8   :  { %287 = vmatprep.subr.bf16.mxu0 %v361_v3 }
   0x9   :  { %307 = vmatpush1.bf16.msra.mxu1 %v306_v11 }
   0xa   :  { %308 = vmatprep.subr.bf16.mxu1 %v361_v3 }
   0xb   :  { %289 = vmatpush3.bf16.msra.mxu0 %v288_v17 }
   0xc   :  { %290 = vmatprep.subr.bf16.mxu0 %v361_v3 }
   0xd   :  { %9 = vsyncpa [#allocation3], 0  ;;  %310 = vmatpush1.bf16.msra.mxu1 %v309_v21  ;;  %v312_v27 = vpack.c.bf16 %v132_v23, %v131_v22  ;;  %v133_v28 = vld [vmem:[%s528_s3 + $0x40] sm:$0xff]  ;;  %v134_v29 = vld [vmem:[%s528_s3 + $0x48] sm:$0xff]  ;;  %v294_v30 = vpack.c.bf16 %v45_v26, %v44_v25  ;;  %v20_v52 = vlaneseq  ;;  %vm144_vm1 = vcmask 195584  }
   0xe   :  { %311 = vmatprep.subr.bf16.mxu1 %v361_v3  ;;  %v46_v31 = vld [vmem:[%s527_s2 + $0x40] sm:$0xff]  ;;  %v47_v32 = vld [vmem:[%s527_s2 + $0x48] sm:$0xff]  ;;  %v315_v33 = vpack.c.bf16 %v134_v29, %v133_v28  ;;  %v135_v34 = vld [vmem:[%s528_s3 + $0x50] sm:$0xff]  ;;  %v364_v57 = vmov 1.0   ;;  %vm51_vm4 = vcmask 850944   ;;  %vm219_vm6 = vcmask 261120  }
   0xf   :  { %292 = vmatpush3.bf16.msra.mxu0 %v291_v24  ;;  %v136_v35 = vld [vmem:[%s528_s3 + $0x58] sm:$0xff]  ;;  %v297_v36 = vpack.c.bf16 %v47_v32, %v46_v31  ;;  %v48_v37 = vld [vmem:[%s527_s2 + $0x50] sm:$0xff]  ;;  %v137_v40 = vld [vmem:[%s528_s3 + $0x60] sm:$0xff]  ;;  %v21_v53 = vand.u32 127, %v20_v52 }
  0x10   :  { %293 = vmatprep.subr.bf16.mxu0 %v361_v3  ;;  %v49_v38 = vld [vmem:[%s527_s2 + $0x58] sm:$0xff]  ;;  %v318_v39 = vpack.c.bf16 %v136_v35, %v135_v34  ;;  %v138_v41 = vld [vmem:[%s528_s3 + $0x68] sm:$0xff]  ;;  %v139_v44 = vld [vmem:[%s528_s3 + $0x70] sm:$0xff] }
  0x11   :  { %313 = vmatpush1.bf16.msra.mxu1 %v312_v27  ;;  %v300_v42 = vpack.c.bf16 %v49_v38, %v48_v37  ;;  %v321_v43 = vpack.c.bf16 %v138_v41, %v137_v40  ;;  %v140_v45 = vld [vmem:[%s528_s3 + $0x78] sm:$0xff]  ;;  %v50_v46 = vld [vmem:[%s527_s2 + $0x60] sm:$0xff]  ;;  %v142_v49 = vld [vmem:[%s528_s3 + $0x88] sm:$0xff]  ;;  %v22_v54 = vadd.s32 128, %v21_v53 }
  0x12   :  { %314 = vmatprep.subr.bf16.mxu1 %v361_v3  ;;  %v324_v47 = vpack.c.bf16 %v140_v45, %v139_v44  ;;  %v141_v48 = vld [vmem:[%s528_s3 + $0x80] sm:$0xff]  ;;  %v143_v51 = vld [vmem:[%s528_s3 + $0x90] sm:$0xff]  ;;  %s365_s3 = smov [#allocation2]  }
  0x13   :  { %295 = vmatpush3.bf16.msra.mxu0 %v294_v30  ;;  %v327_v50 = vpack.c.bf16 %v142_v49, %v141_v48  ;;  %s227_s25 = sshll.u32 %s365_s3, 4  ;;  %s228_s25 = int_to_ptr.vmem [resolvable:$true] %s227_s25 }
  0x14   :  { %296 = vmatprep.subr.bf16.mxu0 %v361_v3  ;;  %s336_s26 = scalar_lea.vmem %s228_s25, 128  ;;  %p341_p1 = scmp.lt.s32.totalorder %s228_s25, %s228_s25 }
  0x15   :  { %316 = vmatpush1.bf16.msra.mxu1 %v315_v33  ;;  %p337_p0 = scmp.ne.s32.totalorder %s228_s25, %s336_s26  ;;  %p342_p2 = scmp.lt.s32.totalorder %s336_s26, %s336_s26 }
  0x16   :  { %317 = vmatprep.subr.bf16.mxu1 %v361_v3 }
  0x17   :  { %298 = vmatpush3.bf16.msra.mxu0 %v297_v36  ;;  %p343_p3 = por %p342_p2, %p341_p1 }
  0x18   :  { %299 = vmatprep.subr.bf16.mxu0 %v361_v3 }
  0x19   :  { %319 = vmatpush1.bf16.msra.mxu1 %v318_v39  ;;  %p344_p4 = pnand %p343_p3, %p337_p0 }
  0x1a   :  { %320 = vmatprep.subr.bf16.mxu1 %v361_v3 }
  0x1b   :  { %301 = vmatpush3.bf16.msra.mxu0 %v300_v42 }
  0x1c   :  { %279 = vmatprep.subr.mxu0 %v363_v20 }
  0x1d   :  { %322 = vmatpush1.bf16.msra.mxu1 %v321_v43 }
  0x1e   :  { %323 = vmatprep.subr.bf16.mxu1 %v361_v3 }
  0x1f   :  { %280 = vmatpush3.msra.mxu0 %v50_v46 }
  0x21   :  { %325 = vmatpush1.bf16.msra.mxu1 %v324_v47 }
  0x22   :  { %326 = vmatprep.subr.bf16.mxu1 %v361_v3 }
  0x25   :  { %328 = vmatpush1.bf16.msra.mxu1 %v327_v50 }
  0x26   :  { %184 = vmatprep.subr.mxu1 %v363_v20 }
  0x29   :  { %185 = vmatpush1.msra.mxu1 %v143_v51 }
  0x81   :  { %v31_v55 = vpop.permute.xlu0 %30 }
  0x82   :  { %vm33_vm2 = vcmp.eq.s32.totalorder %v22_v54, %v31_v55  ;;  %vm32_vm3 = vcmp.eq.s32.totalorder %v21_v53, %v31_v55 }
  0x83   :  { %v237_v56 = vsel %vm33_vm2, 1.0, %v363_v20 }
  0x84   :  { %239 = vmatprep.mubr.msk.f32.mxu1 %vm144_vm1, %v237_v56 }
  0x85   :  { %240 = vmatmul.mubr.msk.f32.vlgmr.msra.gmra.mrb[0].mxu1 %vm32_vm3, %v364_v57  ;;  %v25_v58 = vpop.permute.xlu0 %24 }
  0x86   :  { %vm26_vm5 = vcmp.eq.s32.totalorder %v21_v53, %v25_v58 }
  0x87   :  { %v235_v59 = vsel %vm26_vm5, 1.0, %v363_v20 }
  0x88   :  { %282 = vmatmul.mubr.msk.f32.vlgmr.msra.gmra.mrb[0].mxu0 %vm51_vm4, %v235_v59 }
 0x158   :  { %v214_v60 = vpop.f32.mrb[0].mxu1 }
 0x159   :  { %v216_v61 = vpop.f32.mrb[1].mxu1 }
 0x15b   :  { %v121_v62 = vpop.f32.mrb[0].mxu0 }
 0x15c   :  { %v218_v63 = vmul.f32 %v214_v60, %v121_v62  ;;  %v283_v0 = vpop.f32.mrb[1].mxu0 }
 0x15e   :  { %220 = vst.msk [vmem:[#allocation2] sm:$0xff] %vm219_vm6, %v218_v63 }
 0x15f   :  { %347 = shalt.err (!%p344_p4)
}
 0x160   :  { %s348_s29 = scalar_lea.hbm %s529_s4, 128 }
 0x161   :  { %p349_p5 = scmp.ne.s32.totalorder %s529_s4, %s348_s29  ;;  %p352_p6 = scmp.lt.u32.totalorder %s348_s29, %s529_s4 }
 0x163   :  { %p354_p7 = pnand %p352_p6, %p349_p5 }
 0x165   :  { %357 = shalt.err (!%p354_p7)
}
 0x166   :  { %230 = dma.vmem_to_hbm [thread:$0]  %s228_s25, 128, %s529_s4, [#allocation3]  }
 0x167   :  { %358 = dma.done.wait [#allocation3], 128  }
 0x168   :  { %359 = vsyncadd [#allocation3], 4294967168 }
 0x169   :  { %234 = vsyncpa [#allocation3], 1 }

</bundles_post_ra>
